<compile_context>
chip_gen: v7x
topology: tpu7x:2x2x1
jax: 0.10.0
libtpu: 0.0.40
codegen_flags: <defaults>
</compile_context>

<pallas_src>
import math
from functools import partial

import jax
import jax.numpy as jnp
from jax.experimental import pallas as pl
from jax.experimental.pallas import tpu as pltpu


def autopad(k, p=None):
    # matches the PyTorch helper (string-eval branch dropped)
    if p is None:
        p = k // 2 if isinstance(k, int) else [v // 2 for v in k]
    return p


def _round_up(x, m):
    return ((x + m - 1) // m) * m


def _make_conv_bn_act_kernel(apply_act):
    """GEMM + fused BatchNorm(scale,shift) + SiLU epilogue for one (TM, TN) tile."""

    def kernel(a_ref, w_ref, scale_ref, shift_ref, o_ref, acc_ref):
        @pl.when(pl.program_id(2) == 0)
        def _init():
            acc_ref[...] = jnp.zeros_like(acc_ref)

        acc_ref[...] += jnp.dot(
            a_ref[...], w_ref[...], preferred_element_type=jnp.float32
        )

        @pl.when(pl.program_id(2) == pl.num_programs(2) - 1)
        def _epilogue():
            y = acc_ref[...] * scale_ref[...] + shift_ref[...]  # BatchNorm (eval)
            if apply_act:
                y = y * (1.0 / (1.0 + jnp.exp(-y)))             # SiLU = x*sigmoid(x)
            o_ref[...] = y.astype(o_ref.dtype)

    return kernel


def conv_bn_act(x, weight, gamma, beta, running_mean, running_var, *,
                stride=1, padding=None, groups=1, eps=1e-5, act=True):
    """Equivalent of Conv.forward: SiLU(BatchNorm2d(Conv2d(x, weight, bias=None)))."""
    assert groups == 1  # TODO(synk): grouped convolution (g > 1) not implemented
    N, C_in, H, W = x.shape
    C_out, C_in_w, kH, kW = weight.shape
    assert C_in_w == C_in
    s = int(stride)
    p = autopad(kH, padding)
    if isinstance(p, (list, tuple)):
        p = int(p[0])
    p = int(p)

    # ---- im2col (layout plumbing done by XLA in the wrapper) -------------
    x_nhwc = jnp.transpose(x, (0, 2, 3, 1))                    # NCHW -> NHWC
    x_pad = jnp.pad(x_nhwc, ((0, 0), (p, p), (p, p), (0, 0)))
    H_out = (H + 2 * p - kH) // s + 1
    W_out = (W + 2 * p - kW) // s + 1

    patches = []
    for i in range(kH):
        for j in range(kW):
            patches.append(x_pad[:, i:i + s * H_out:s, j:j + s * W_out:s, :])
    a = jnp.concatenate(patches, axis=-1).reshape(
        N * H_out * W_out, kH * kW * C_in)                     # (M, K)

    # weight (O, I, kH, kW) -> (kH, kW, I, O) -> (K, C_out), matching patch order
    w_col = jnp.transpose(weight, (2, 3, 1, 0)).reshape(kH * kW * C_in, C_out)

    # ---- fold eval-mode BatchNorm into per-channel scale / shift ---------
    scale = (gamma / jnp.sqrt(running_var + eps)).astype(jnp.float32)
    shift = (beta - running_mean * scale).astype(jnp.float32)

    # ---- tiling / padding -------------------------------------------------
    M, K = int(a.shape[0]), int(a.shape[1])
    TM = min(256, _round_up(M, 8))
    M_pad = _round_up(M, TM)

    TN = 128                                    # lane-dense, unmasked stores
    N_pad = _round_up(C_out, TN)

    K_al = _round_up(K, 8)
    if K_al <= 2048:                            # typical conv reductions: keep whole
        TK, K_pad = K_al, K_al
    else:                                       # very deep reductions: tile K
        TK = 512
        K_pad = _round_up(K, TK)

    a_p = jnp.pad(a, ((0, M_pad - M), (0, K_pad - K)))
    w_p = jnp.pad(w_col, ((0, K_pad - K), (0, N_pad - C_out)))
    scale_p = jnp.pad(scale, (0, N_pad - C_out)).reshape(1, N_pad)
    shift_p = jnp.pad(shift, (0, N_pad - C_out)).reshape(1, N_pad)

    grid = (M_pad // TM, N_pad // TN, K_pad // TK)
    itemsize = jnp.dtype(x.dtype).itemsize
    cost = pl.CostEstimate(
        flops=2 * M * K * C_out,
        transcendentals=(M * C_out) if act else 0,
        bytes_accessed=itemsize * (M_pad * K_pad + K_pad * N_pad + M_pad * N_pad),
    )

    out_p = pl.pallas_call(
        _make_conv_bn_act_kernel(bool(act)),
        out_shape=jax.ShapeDtypeStruct((M_pad, N_pad), x.dtype),
        grid_spec=pltpu.PrefetchScalarGridSpec(
            num_scalar_prefetch=0,
            grid=grid,
            in_specs=[
                pl.BlockSpec((TM, TK), lambda m, n, k: (m, k)),   # im2col tile
                pl.BlockSpec((TK, TN), lambda m, n, k: (k, n)),   # weight tile
                pl.BlockSpec((1, TN), lambda m, n, k: (0, n)),    # BN scale
                pl.BlockSpec((1, TN), lambda m, n, k: (0, n)),    # BN shift
            ],
            out_specs=pl.BlockSpec((TM, TN), lambda m, n, k: (m, n)),
            scratch_shapes=[pltpu.VMEM((TM, TN), jnp.float32)],
        ),
        compiler_params=pltpu.CompilerParams(
            dimension_semantics=("parallel", "parallel", "arbitrary"),
        ),
        cost_estimate=cost,
    )(a_p, w_p, scale_p, shift_p)

    y = out_p[:M, :C_out].reshape(N, H_out, W_out, C_out)
    return jnp.transpose(y, (0, 3, 1, 2))                      # NHWC -> NCHW


if __name__ == "__main__":
    key = jax.random.PRNGKey(0)
    ks = jax.random.split(key, 8)

    N, C_in, H, W = 2, 4, 16, 16
    C_out, k, s = 8, 3, 1
    p = autopad(k)
    eps = 1e-5

    x = jax.random.normal(ks[0], (N, C_in, H, W), dtype=jnp.float32)
    weight = 0.1 * jax.random.normal(ks[1], (C_out, C_in, k, k), dtype=jnp.float32)
    gamma = 1.0 + 0.1 * jax.random.normal(ks[2], (C_out,), dtype=jnp.float32)
    beta = 0.1 * jax.random.normal(ks[3], (C_out,), dtype=jnp.float32)
    r_mean = 0.1 * jax.random.normal(ks[4], (C_out,), dtype=jnp.float32)
    r_var = jax.random.uniform(ks[5], (C_out,), minval=0.5, maxval=1.5,
                               dtype=jnp.float32)

    out = conv_bn_act(x, weight, gamma, beta, r_mean, r_var,
                      stride=s, padding=p, groups=1, eps=eps, act=True)
    out = jax.block_until_ready(out)
    assert out.shape == (N, C_out, H, W), out.shape

    # pure-JAX reference: Conv2d (no bias) -> eval-mode BatchNorm2d -> SiLU
    conv_ref = jax.lax.conv_general_dilated(
        x, weight, window_strides=(s, s), padding=[(p, p), (p, p)],
        dimension_numbers=("NCHW", "OIHW", "NCHW"))
    sc = (gamma / jnp.sqrt(r_var + eps)).reshape(1, C_out, 1, 1)
    sh = (beta - r_mean * gamma / jnp.sqrt(r_var + eps)).reshape(1, C_out, 1, 1)
    bn_ref = conv_ref * sc + sh
    ref = bn_ref * jax.nn.sigmoid(bn_ref)
    assert jnp.allclose(out, ref, atol=1e-4, rtol=1e-4), \
        float(jnp.max(jnp.abs(out - ref)))

    # also exercise the module's default k=1 (pointwise) path
    w1 = 0.1 * jax.random.normal(ks[6], (C_out, C_in, 1, 1), dtype=jnp.float32)
    out1 = jax.block_until_ready(
        conv_bn_act(x, w1, gamma, beta, r_mean, r_var,
                    stride=1, padding=autopad(1), groups=1, eps=eps, act=True))
    conv_ref1 = jax.lax.conv_general_dilated(
        x, w1, window_strides=(1, 1), padding=[(0, 0), (0, 0)],
        dimension_numbers=("NCHW", "OIHW", "NCHW"))
    bn1 = conv_ref1 * sc + sh
    ref1 = bn1 * jax.nn.sigmoid(bn1)
    assert out1.shape == (N, C_out, H, W), out1.shape
    assert jnp.allclose(out1, ref1, atol=1e-4, rtol=1e-4), \
        float(jnp.max(jnp.abs(out1 - ref1)))

    print("KERNEL_OK")
</pallas_src>

<mosaic_0001>
module attributes {stable_mosaic.version = 11 : i64} {
  func.func @kernel(%arg0: i32, %arg1: i32, %arg2: i32, %arg3: memref<256x40xf32, #tpu.memory_space<vmem>>, %arg4: memref<40x128xf32, #tpu.memory_space<vmem>>, %arg5: memref<1x128xf32, #tpu.memory_space<vmem>>, %arg6: memref<1x128xf32, #tpu.memory_space<vmem>>, %arg7: memref<256x128xf32, #tpu.memory_space<vmem>>, %arg8: memref<256x128xf32, #tpu.memory_space<vmem>>) attributes {dimension_semantics = [#tpu.dimension_semantics<parallel>, #tpu.dimension_semantics<parallel>, #tpu.dimension_semantics<arbitrary>], iteration_bounds = array<i64: 2, 1, 1>, scalar_prefetch = 0 : i64, scratch_operands = 1 : i64, tpu.core_type = #tpu.core_type<tc>, window_params = [{transform_indices = @transform_0, window_bounds = array<i64: 256, 40>}, {transform_indices = @transform_1, window_bounds = array<i64: 40, 128>}, {transform_indices = @transform_2, window_bounds = array<i64: 1, 128>}, {transform_indices = @transform_3, window_bounds = array<i64: 1, 128>}, {transform_indices = @transform_4, window_bounds = array<i64: 256, 128>}]} {
    %c0_i32 = arith.constant 0 : i32
    %0 = arith.cmpi eq, %arg2, %c0_i32 : i32
    %1 = arith.extui %0 : i1 to i32
    %c0_i32_0 = arith.constant 0 : i32
    %2 = arith.cmpi ne, %1, %c0_i32_0 : i32
    scf.if %2 {
      %cst_10 = arith.constant 0.000000e+00 : f32
      %12 = vector.broadcast %cst_10 : f32 to vector<256x128xf32>
      %c0_11 = arith.constant 0 : index
      %c0_12 = arith.constant 0 : index
      %13 = vector.load %arg8[%c0_11, %c0_12] : memref<256x128xf32, #tpu.memory_space<vmem>>, vector<256x128xf32>
      tpu.vector_store %arg8[%c0_11, %c0_12], %12 {strides = array<i32>} : memref<256x128xf32, #tpu.memory_space<vmem>>, vector<256x128xf32>,
    } else {
    }
    %c0 = arith.constant 0 : index
    %c0_1 = arith.constant 0 : index
    %3 = vector.load %arg8[%c0, %c0_1] : memref<256x128xf32, #tpu.memory_space<vmem>>, vector<256x128xf32>
    %c0_2 = arith.constant 0 : index
    %c0_3 = arith.constant 0 : index
    %4 = vector.load %arg3[%c0_2, %c0_3] : memref<256x40xf32, #tpu.memory_space<vmem>>, vector<256x40xf32>
    %c0_4 = arith.constant 0 : index
    %c0_5 = arith.constant 0 : index
    %5 = vector.load %arg4[%c0_4, %c0_5] : memref<40x128xf32, #tpu.memory_space<vmem>>, vector<40x128xf32>
    %cst = arith.constant dense<0.000000e+00> : vector<256x128xf32>
    %6 = tpu.matmul %4, %5, %cst {dimension_numbers = #tpu.dot_dimension_numbers<[1], [0], [0], [1], [0, 0, 1, 1], [], []>} : vector<256x40xf32>, vector<40x128xf32>, vector<256x128xf32> -> vector<256x128xf32>
    %7 = arith.addf %3, %6 : vector<256x128xf32>
    %c0_6 = arith.constant 0 : index
    %c0_7 = arith.constant 0 : index
    %8 = vector.load %arg8[%c0_6, %c0_7] : memref<256x128xf32, #tpu.memory_space<vmem>>, vector<256x128xf32>
    tpu.vector_store %arg8[%c0_6, %c0_7], %7 {strides = array<i32>} : memref<256x128xf32, #tpu.memory_space<vmem>>, vector<256x128xf32>,
    %c0_i32_8 = arith.constant 0 : i32
    %9 = arith.cmpi eq, %arg2, %c0_i32_8 : i32
    %10 = arith.extui %9 : i1 to i32
    %c0_i32_9 = arith.constant 0 : i32
    %11 = arith.cmpi ne, %10, %c0_i32_9 : i32
    scf.if %11 {
      %c0_10 = arith.constant 0 : index
      %c0_11 = arith.constant 0 : index
      %12 = vector.load %arg8[%c0_10, %c0_11] : memref<256x128xf32, #tpu.memory_space<vmem>>, vector<256x128xf32>
      %c0_12 = arith.constant 0 : index
      %c0_13 = arith.constant 0 : index
      %13 = vector.load %arg5[%c0_12, %c0_13] : memref<1x128xf32, #tpu.memory_space<vmem>>, vector<1x128xf32>
      %14 = vector.broadcast %13 : vector<1x128xf32> to vector<256x128xf32>
      %15 = arith.mulf %12, %14 : vector<256x128xf32>
      %c0_14 = arith.constant 0 : index
      %c0_15 = arith.constant 0 : index
      %16 = vector.load %arg6[%c0_14, %c0_15] : memref<1x128xf32, #tpu.memory_space<vmem>>, vector<1x128xf32>
      %17 = vector.broadcast %16 : vector<1x128xf32> to vector<256x128xf32>
      %18 = arith.addf %15, %17 : vector<256x128xf32>
      %cst_16 = arith.constant 0.000000e+00 : f32
      %19 = vector.broadcast %cst_16 : f32 to vector<256x128xf32>
      %20 = arith.subf %19, %18 : vector<256x128xf32>
      %21 = math.exp %20 : vector<256x128xf32>
      %cst_17 = arith.constant 1.000000e+00 : f32
      %22 = vector.broadcast %cst_17 : f32 to vector<256x128xf32>
      %23 = arith.addf %22, %21 : vector<256x128xf32>
      %cst_18 = arith.constant 1.000000e+00 : f32
      %24 = vector.broadcast %cst_18 : f32 to vector<256x128xf32>
      %25 = arith.divf %24, %23 : vector<256x128xf32>
      %26 = arith.mulf %18, %25 : vector<256x128xf32>
      %c0_19 = arith.constant 0 : index
      %c0_20 = arith.constant 0 : index
      %27 = vector.load %arg7[%c0_19, %c0_20] : memref<256x128xf32, #tpu.memory_space<vmem>>, vector<256x128xf32>
      tpu.vector_store %arg7[%c0_19, %c0_20], %26 {strides = array<i32>} : memref<256x128xf32, #tpu.memory_space<vmem>>, vector<256x128xf32>,
    } else {
    }
    return
  }
  func.func @transform_0(%arg0: i32, %arg1: i32, %arg2: i32) -> (i32, i32) {
    %c0_i32 = arith.constant 0 : i32
    return %arg0, %arg2 : i32, i32
  }
  func.func @transform_1(%arg0: i32, %arg1: i32, %arg2: i32) -> (i32, i32) {
    %c0_i32 = arith.constant 0 : i32
    return %arg2, %arg1 : i32, i32
  }
  func.func @transform_2(%arg0: i32, %arg1: i32, %arg2: i32) -> (i32, i32) {
    %c0_i32 = arith.constant 0 : i32
    %c0_i32_0 = arith.constant 0 : i32
    return %c0_i32, %arg1 : i32, i32
  }
  func.func @transform_3(%arg0: i32, %arg1: i32, %arg2: i32) -> (i32, i32) {
    %c0_i32 = arith.constant 0 : i32
    %c0_i32_0 = arith.constant 0 : i32
    return %c0_i32, %arg1 : i32, i32
  }
  func.func @transform_4(%arg0: i32, %arg1: i32, %arg2: i32) -> (i32, i32) {
    %c0_i32 = arith.constant 0 : i32
    return %arg0, %arg1 : i32, i32
  }
}

</mosaic_0001>

<bundles_post_ra>
// kernel: tpu_custom_call.1
= control target key start
LH: loop header
LB: loop body
LE: loop exit
PB: predicated region body
PF: predicated region fallthrough
CT: control target
= control target key end

     0   :  { %9 = vsyncpa [#allocation4], 0  ;;  %s2209_s0 = inlined_call_operand.vmem [shape: f32[512,40], index: 0, kind: input, shape index: {}]   ;;  %s2210_s1 = inlined_call_operand.vmem [shape: f32[40,128], index: 1, kind: input, shape index: {}]   ;;  %s2211_s2 = inlined_call_operand.vmem [shape: f32[1,128], index: 2, kind: input, shape index: {}]   ;;  %s2212_s3 = inlined_call_operand.vmem [shape: f32[1,128], index: 3, kind: input, shape index: {}]   ;;  %s2213_s4 = inlined_call_operand.hbm [shape: f32[512,128], index: 4, kind: output, shape index: {}]  }
   0x1   :  { %11 = vsyncpa [#allocation4 + $0x1], 0  ;;  %s1740_s15 = smov 0   ;;  %s1742_s16 = smov 0  }
   0x2   :  { %s1744_s17 = smov 0   ;;  %s1746_s18 = smov 0  }
   0x3   :  { %s1748_s19 = smov 0   ;;  %s1750_s20 = smov 0  }
   0x4 LB: > { %s1287_s21 = sadd.s32 4294967295, %s1710_s20   ;;  %s1288_s22 = sadd.s32 4294967294, %s1710_s20   ;;  %s1710_s20 = sphi %s1750_s20, %s17_s20   ;;  %s1706_s19 = sphi %s1748_s19, %s2220_s19   ;;  %s1702_s18 = sphi %s1746_s18, %s2219_s18   ;;  %s1698_s17 = sphi %s1744_s17, %s2218_s17   ;;  %s1694_s16 = sphi %s1742_s16, %s2217_s16   ;;  %s1690_s15 = sphi %s1740_s15, %s2216_s15  }
   0x5   : > { %s36_s23 = sadd.s32 1, %s1706_s19  ;;  %s153_s24 = sadd.s32 1, %s1698_s17 }
   0x6   : > { %p38_p0 = scmp.ge.s32.totalorder %s36_s23, 2  ;;  %p163_p1 = scmp.ne.s32.totalorder %s1698_s17, %s1694_s16 }
   0x7   : > { %p164_p2 = scmp.eq.s32.totalorder %s1287_s21, 1  ;;  %p169_p3 = scmp.ne.s32.totalorder %s1694_s16, %s1690_s15 }
   0x8   : > { %s2222_s23 = smov (%p38_p0, %s36_s23), 0  ;;  %p170_p5 = scmp.eq.s32.totalorder %s1288_s22, 1 }
   0x9   : > { %p1780_p4 = por %p164_p2, %p163_p1  ;;  %s148_s26 = ssub.s32 %s1706_s19, %s2222_s23 }
   0xa   : > { %p1294_p6 = scmp.ge.s32.totalorder %s1710_s20, 1  ;;  %p151_p7 = scmp.eq.s32.totalorder %s148_s26, 0 }
   0xb   : > { %p1787_p8 = por %p170_p5, %p169_p3  ;;  %p224_p9 = scmp.lt.s32.totalorder %s1710_s20, 3 }
   0xc   : > { %s1793_s28 = scalar_select %p151_p7, %s1698_s17, %s153_s24  }
   0xd   : > { %p225_p10 = pnand %p1294_p6, %p224_p9 }
   0xe   : > { %v392_v0 = vld [vmem:[%s2210_s1] sm:$0xff] (!%p225_p10)  ;;  %v393_v1 = vld [vmem:[%s2210_s1 + $0x8] sm:$0xff] (!%p225_p10)  ;;  %v394_v2 = vld [vmem:[%s2210_s1 + $0x10] sm:$0xff] (!%p225_p10)  ;;  %s1296_s9 = sshll.u32 (!%p225_p10), %s1702_s18, 5  ;;  %vm397_vm0 = vcmask (!%p225_p10), 326656   ;;  %s264_s6 = sand.u32 (!%p225_p10), 1, %s1694_s16  }
   0xf   : > { %228 = sbr.rel (%p225_p10) target bundleno = 347 (0x15b), region = 36  ;;  %v1433_v3 = vpack.c.bf16 (!%p225_p10), %v393_v1, %v392_v0  ;;  %v395_v4 = vld [vmem:[%s2210_s1 + $0x18] sm:$0xff] (!%p225_p10)  ;;  %p268_p11 = scmp.lt.s32.totalorder (!%p225_p10), %s1296_s9, 63  ;;  %v396_v6 = vld [vmem:[%s2210_s1 + $0x20] sm:$0xff] (!%p225_p10) }
  0x10   : > { %v1437_v5 = vpack.c.bf16 (!%p225_p10), %v395_v4, %v394_v2  ;;  %v1883_v39 = vld [vmem:[%s2211_s2] ss:$0 sm:$0xff] (!%p225_p10)  ;;  %s2004_s7 = sshll.u32 (!%p225_p10), %s264_s6, 8  ;;  %s2163_s13 = scalar_lea.sflag (!%p225_p10), [#allocation4], %s264_s6 }
  0x11   : > { %1434 = vmatprep.subr.bf16.mxu0 (!%p225_p10), %v1433_v3  ;;  %1441 = vmatprep.subr.bf16.mxu1 (!%p225_p10), %v1433_v3  ;;  %v1888_v41 = vld [vmem:[%s2212_s3] ss:$0 sm:$0xff] (!%p225_p10)  ;;  %s2033_s8 = scalar_lea.vmem (!%p225_p10), [#allocation3], %s2004_s7  ;;  %s1712_s21 = smov (!%p225_p10), [#allocation3]  }
  0x12   : > { %1436 = vmatpush3.bf16.msra.mxu0 (!%p225_p10), %v1433_v3  ;;  %1444 = vmatpush3.bf16.msra.mxu1 (!%p225_p10), %v1433_v3  ;;  %s1167_s10 = sshll.u32 (!%p225_p10), %s2033_s8, 4  ;;  %s1636_s22 = sshll.u32 (!%p225_p10), %s1712_s21, 4  ;;  %s2155_s10 = int_to_ptr.vmem [resolvable:$true] %s1167_s10  ;;  %s1637_s22 = int_to_ptr.vmem [resolvable:$false] %s1636_s22 }
  0x13   : > { %1438 = vmatprep.subr.bf16.mxu0 (!%p225_p10), %v1437_v5  ;;  %1442 = vmatprep.subr.bf16.mxu1 (!%p225_p10), %v1437_v5  ;;  %s1632_s14 = scalar_lea.vmem (!%p225_p10), %s2155_s10, 4096  ;;  %p1639_p1 = scmp.lt.s32.totalorder (!%p225_p10), %s2155_s10, %s1637_s22 }
  0x14   : > { %p1633_p12 = scmp.ne.s32.totalorder (!%p225_p10), %s2155_s10, %s1632_s14 }
  0x16   : > { %s2224_s9 = smov (!%p268_p11, %s1296_s9), 63  ;;  %1440 = vmatpush3.bf16.msra.mxu0 %v1437_v5  ;;  %1445 = vmatpush3.bf16.msra.mxu1 %v1437_v5  ;;  %p1634_p13 = pnand %p1633_p12, %p1780_p4 }
  0x17   : > { %s1297_s12 = sshll.u32 %s2224_s9, 3  ;;  %1383 = vmatprep.subr.mxu0 %v396_v6  ;;  %1443 = vmatprep.subr.mxu1 %v396_v6  ;;  %s1337_s9 = sshll.u32 %s1702_s18, 12 }
  0x18   : > { %s1814_s24 = scalar_lea.vmem %s2209_s0, %s1297_s12  ;;  %s2153_s18 = scalar_lea.hbm %s2213_s4, %s1337_s9 }
  0x19   : > { %v360_v7 = vld [vmem:[%s1814_s24] sm:$0xff]  ;;  %v361_v9 = vld [vmem:[%s1814_s24 + $0x8] sm:$0xff]  ;;  %v362_v11 = vld [vmem:[%s1814_s24 + $0x10] sm:$0xff]  ;;  %p1635_p0 = pneg %p1634_p13 }
  0x1a   : > { %v376_v8 = vld [vmem:[%s1814_s24 + $0x80] sm:$0xff]  ;;  %1385 = vmatprep.mubr.msk.f32.mxu0 %vm397_vm0, %v360_v7  ;;  %v377_v10 = vld [vmem:[%s1814_s24 + $0x88] sm:$0xff]  ;;  %v378_v12 = vld [vmem:[%s1814_s24 + $0x90] sm:$0xff]  ;;  %1384 = vmatpush3.msra.mxu0 %v396_v6 }
  0x1b   : > { %1409 = vmatprep.mubr.msk.f32.mxu1 %vm397_vm0, %v376_v8  ;;  %1446 = vmatpush3.msra.mxu1 %v396_v6  ;;  %v363_v13 = vld [vmem:[%s1814_s24 + $0x18] sm:$0xff]  ;;  %v364_v15 = vld [vmem:[%s1814_s24 + $0x20] sm:$0xff]  ;;  %v365_v17 = vld [vmem:[%s1814_s24 + $0x28] sm:$0xff] }
  0x1c   : > { %1386 = vmatmul.mubr.msk.f32.vlgmr.msra.gmra.mrb[0].mxu0 %vm397_vm0, %v361_v9  ;;  %1410 = vmatmul.mubr.msk.f32.vlgmr.msra.gmra.mrb[0].mxu1 %vm397_vm0, %v377_v10  ;;  %v379_v14 = vld [vmem:[%s1814_s24 + $0x98] sm:$0xff]  ;;  %v380_v16 = vld [vmem:[%s1814_s24 + $0xa0] sm:$0xff]  ;;  %v381_v18 = vld [vmem:[%s1814_s24 + $0xa8] sm:$0xff] }
  0x1d   : > { %1388 = vmatprep.mubr.msk.f32.mxu0 %vm397_vm0, %v362_v11  ;;  %1412 = vmatprep.mubr.msk.f32.mxu1 %vm397_vm0, %v378_v12  ;;  %v366_v19 = vld [vmem:[%s1814_s24 + $0x30] sm:$0xff]  ;;  %v367_v21 = vld [vmem:[%s1814_s24 + $0x38] sm:$0xff]  ;;  %v368_v23 = vld [vmem:[%s1814_s24 + $0x40] sm:$0xff] }
  0x1e   : > { %v382_v20 = vld [vmem:[%s1814_s24 + $0xb0] sm:$0xff]  ;;  %v383_v22 = vld [vmem:[%s1814_s24 + $0xb8] sm:$0xff]  ;;  %v384_v24 = vld [vmem:[%s1814_s24 + $0xc0] sm:$0xff] }
  0x1f   : > { %v369_v25 = vld [vmem:[%s1814_s24 + $0x48] sm:$0xff]  ;;  %v370_v27 = vld [vmem:[%s1814_s24 + $0x50] sm:$0xff]  ;;  %v371_v29 = vld [vmem:[%s1814_s24 + $0x58] sm:$0xff] }
  0x20   : > { %1389 = vmatmul.mubr.msk.f32.gmra.mrb[2].mxu0 %vm397_vm0, %v363_v13  ;;  %1413 = vmatmul.mubr.msk.f32.gmra.mrb[2].mxu1 %vm397_vm0, %v379_v14  ;;  %v385_v26 = vld [vmem:[%s1814_s24 + $0xc8] sm:$0xff]  ;;  %v386_v28 = vld [vmem:[%s1814_s24 + $0xd0] sm:$0xff]  ;;  %v387_v30 = vld [vmem:[%s1814_s24 + $0xd8] sm:$0xff] }
  0x21   : > { %1391 = vmatprep.mubr.msk.f32.mxu0 %vm397_vm0, %v364_v15  ;;  %1415 = vmatprep.mubr.msk.f32.mxu1 %vm397_vm0, %v380_v16  ;;  %v372_v31 = vld [vmem:[%s1814_s24 + $0x60] sm:$0xff]  ;;  %v373_v33 = vld [vmem:[%s1814_s24 + $0x68] sm:$0xff]  ;;  %v374_v35 = vld [vmem:[%s1814_s24 + $0x70] sm:$0xff] }
  0x22   : > { %v388_v32 = vld [vmem:[%s1814_s24 + $0xe0] sm:$0xff]  ;;  %v389_v34 = vld [vmem:[%s1814_s24 + $0xe8] sm:$0xff]  ;;  %v390_v36 = vld [vmem:[%s1814_s24 + $0xf0] sm:$0xff] }
  0x23   : > { %v375_v37 = vld [vmem:[%s1814_s24 + $0x78] sm:$0xff] }
  0x24   : > { %1392 = vmatmul.mubr.msk.f32.gmra.mrb[4].mxu0 %vm397_vm0, %v365_v17  ;;  %1416 = vmatmul.mubr.msk.f32.gmra.mrb[4].mxu1 %vm397_vm0, %v381_v18  ;;  %v391_v38 = vld [vmem:[%s1814_s24 + $0xf8] sm:$0xff]  ;;  %s1638_s24 = scalar_lea.vmem %s1637_s22, 8192 }
  0x25   : > { %1394 = vmatprep.mubr.msk.f32.mxu0 %vm397_vm0, %v366_v19  ;;  %1418 = vmatprep.mubr.msk.f32.mxu1 %vm397_vm0, %v382_v20  ;;  %p1640_p2 = scmp.lt.s32.totalorder %s1638_s24, %s1632_s14 }
  0x27   : > { %p1641_p3 = por %p1640_p2, %p1639_p1 }
  0x28   : > { %1395 = vmatmul.mubr.msk.f32.gmra.mrb[6].mxu0 %vm397_vm0, %v367_v21  ;;  %1419 = vmatmul.mubr.msk.f32.gmra.mrb[6].mxu1 %vm397_vm0, %v383_v22 }
  0x29   : > { %1397 = vmatprep.mubr.msk.f32.mxu0 %vm397_vm0, %v368_v23  ;;  %1421 = vmatprep.mubr.msk.f32.mxu1 %vm397_vm0, %v384_v24  ;;  %p1642_p5 = pnand %p1641_p3, %p1635_p0 }
  0x2c   : > { %1398 = vmatmul.mubr.msk.f32.gmra.mrb[8].mxu0 %vm397_vm0, %v369_v25  ;;  %1422 = vmatmul.mubr.msk.f32.gmra.mrb[8].mxu1 %vm397_vm0, %v385_v26 }
  0x2d   : > { %1400 = vmatprep.mubr.msk.f32.mxu0 %vm397_vm0, %v370_v27  ;;  %1424 = vmatprep.mubr.msk.f32.mxu1 %vm397_vm0, %v386_v28 }
  0x30   : > { %1401 = vmatmul.mubr.msk.f32.gmra.mrb[10].mxu0 %vm397_vm0, %v371_v29  ;;  %1425 = vmatmul.mubr.msk.f32.gmra.mrb[10].mxu1 %vm397_vm0, %v387_v30 }
  0x31   : > { %1403 = vmatprep.mubr.msk.f32.mxu0 %vm397_vm0, %v372_v31  ;;  %1427 = vmatprep.mubr.msk.f32.mxu1 %vm397_vm0, %v388_v32 }
  0x34   : > { %1404 = vmatmul.mubr.msk.f32.gmra.mrb[12].mxu0 %vm397_vm0, %v373_v33  ;;  %1428 = vmatmul.mubr.msk.f32.gmra.mrb[12].mxu1 %vm397_vm0, %v389_v34 }
  0x35   : > { %1406 = vmatprep.mubr.msk.f32.mxu0 %vm397_vm0, %v374_v35  ;;  %1430 = vmatprep.mubr.msk.f32.mxu1 %vm397_vm0, %v390_v36 }
  0x38   : > { %1407 = vmatmul.mubr.msk.f32.gmra.mrb[14].mxu0 %vm397_vm0, %v375_v37  ;;  %1431 = vmatmul.mubr.msk.f32.gmra.mrb[14].mxu1 %vm397_vm0, %v391_v38 }
  0xef   : > { %v1387_v40 = vpop.f32.mrb[0].mxu0  ;;  %v1411_v42 = vpop.f32.mrb[0].mxu1 }
  0xf0   : > { %v826_v43 = vmul.f32 %v1387_v40, %v1883_v39  ;;  %v842_v44 = vmul.f32 %v1411_v42, %v1883_v39  ;;  %v560_v45 = vpop.f32.mrb[1].mxu0  ;;  %v640_v46 = vpop.f32.mrb[1].mxu1 }
  0xf1   : > { %v825_v47 = vmul.f32 %v1883_v39, %v560_v45  ;;  %v841_v48 = vmul.f32 %v1883_v39, %v640_v46 }
  0xf2   : > { %v1895_v49 = vadd.f32 %v1888_v41, %v826_v43  ;;  %v1898_v50 = vadd.f32 %v1888_v41, %v842_v44 }
  0xf3   : > { %v1901_v51 = vadd.f32 %v1888_v41, %v825_v47  ;;  %v1904_v52 = vadd.f32 %v1888_v41, %v841_v48  ;;  %v1390_v53 = vpop.f32.mrb[2].mxu0  ;;  %v1414_v54 = vpop.f32.mrb[2].mxu1 }
  0xf4   : > { %v897_v55 = vsub.f32 0.0, %v1895_v49  ;;  %v913_v56 = vsub.f32 0.0, %v1898_v50  ;;  %v828_v57 = vmul.f32 %v1390_v53, %v1883_v39  ;;  %v844_v58 = vmul.f32 %v1414_v54, %v1883_v39  ;;  %v570_v59 = vpop.f32.mrb[3].mxu0  ;;  %v650_v60 = vpop.f32.mrb[3].mxu1 }
  0xf5   : > { %v896_v61 = vsub.f32 0.0, %v1901_v51  ;;  %v912_v62 = vsub.f32 0.0, %v1904_v52  ;;  %v827_v63 = vmul.f32 %v1883_v39, %v570_v59  ;;  %v843_v0 = vmul.f32 %v1883_v39, %v650_v60 }
  0xf6   : > { %v930_v1 = vmul.f32 1.442695, %v897_v55  ;;  %v962_v2 = vmul.f32 1.442695, %v913_v56  ;;  %v1915_v3 = vadd.f32 %v1888_v41, %v828_v57  ;;  %v1918_v4 = vadd.f32 %v1888_v41, %v844_v58 }
  0xf7   : > { %v928_v5 = vmul.f32 1.442695, %v896_v61  ;;  %v960_v6 = vmul.f32 1.442695, %v912_v62  ;;  %v1921_v7 = vadd.f32 %v1888_v41, %v827_v63  ;;  %v1924_v8 = vadd.f32 %v1888_v41, %v843_v0  ;;  %v1393_v9 = vpop.f32.mrb[4].mxu0  ;;  %v1417_v10 = vpop.f32.mrb[4].mxu1 }
  0xf8   : > { %1504 = vpow2.f32 %v930_v1  ;;  %v899_v11 = vsub.f32 0.0, %v1915_v3  ;;  %v915_v12 = vsub.f32 0.0, %v1918_v4  ;;  %v830_v13 = vmul.f32 %v1393_v9, %v1883_v39  ;;  %v580_v14 = vpop.f32.mrb[5].mxu0  ;;  %v660_v15 = vpop.f32.mrb[5].mxu1 }
  0xf9   : > { %1506 = vpow2.f32 %v962_v2  ;;  %v898_v16 = vsub.f32 0.0, %v1921_v7  ;;  %v914_v17 = vsub.f32 0.0, %v1924_v8  ;;  %v846_v18 = vmul.f32 %v1417_v10, %v1883_v39 }
  0xfa   : > { %1508 = vpow2.f32 %v928_v5  ;;  %v934_v19 = vmul.f32 1.442695, %v899_v11  ;;  %v966_v20 = vmul.f32 1.442695, %v915_v12  ;;  %v1933_v21 = vadd.f32 %v1888_v41, %v830_v13 }
  0xfb   : > { %1510 = vpow2.f32 %v960_v6  ;;  %v932_v22 = vmul.f32 1.442695, %v898_v16  ;;  %v964_v23 = vmul.f32 1.442695, %v914_v17  ;;  %v1936_v24 = vadd.f32 %v1888_v41, %v846_v18  ;;  %v1396_v25 = vpop.f32.mrb[6].mxu0  ;;  %v1420_v26 = vpop.f32.mrb[6].mxu1 }
  0xfc   : > { %1512 = vpow2.f32 %v934_v19  ;;  %v901_v27 = vsub.f32 0.0, %v1933_v21  ;;  %v829_v28 = vmul.f32 %v1883_v39, %v580_v14  ;;  %v845_v29 = vmul.f32 %v1883_v39, %v660_v15  ;;  %v590_v30 = vpop.f32.mrb[7].mxu0  ;;  %v670_v31 = vpop.f32.mrb[7].mxu1 }
  0xfd   : > { %1514 = vpow2.f32 %v966_v20  ;;  %v917_v32 = vsub.f32 0.0, %v1936_v24  ;;  %v832_v33 = vmul.f32 %v1396_v25, %v1883_v39  ;;  %v848_v34 = vmul.f32 %v1420_v26, %v1883_v39 }
  0xfe   : > { %1516 = vpow2.f32 %v932_v22  ;;  %v938_v35 = vmul.f32 1.442695, %v901_v27  ;;  %v1945_v36 = vadd.f32 %v1888_v41, %v829_v28  ;;  %v1948_v37 = vadd.f32 %v1888_v41, %v845_v29 }
  0xff   : > { %1518 = vpow2.f32 %v964_v23  ;;  %v970_v38 = vmul.f32 1.442695, %v917_v32  ;;  %v1951_v40 = vadd.f32 %v1888_v41, %v832_v33  ;;  %v1954_v42 = vadd.f32 %v1888_v41, %v848_v34  ;;  %v1399_v43 = vpop.f32.mrb[8].mxu0  ;;  %v1423_v44 = vpop.f32.mrb[8].mxu1 }
 0x100   : > { %1520 = vpow2.f32 %v938_v35  ;;  %v900_v45 = vsub.f32 0.0, %v1945_v36  ;;  %v916_v46 = vsub.f32 0.0, %v1948_v37  ;;  %v831_v47 = vmul.f32 %v1883_v39, %v590_v30  ;;  %v600_v48 = vpop.f32.mrb[9].mxu0  ;;  %v680_v53 = vpop.f32.mrb[9].mxu1 }
 0x101   : > { %1522 = vpow2.f32 %v970_v38  ;;  %v847_v54 = vmul.f32 %v1883_v39, %v670_v31  ;;  %v903_v57 = vsub.f32 0.0, %v1951_v40  ;;  %v834_v58 = vmul.f32 %v1399_v43, %v1883_v39 }
 0x102   : > { %v1505_v55 = vpop.eup %1504  ;;  %v936_v56 = vmul.f32 1.442695, %v900_v45  ;;  %v919_v61 = vsub.f32 0.0, %v1954_v42  ;;  %v1964_v62 = vadd.f32 %v1888_v41, %v831_v47  ;;  %v1966_v2 = vmul.f32 1.442695, %v916_v46 }
 0x103   : > { %v1507_v59 = vpop.eup %1506  ;;  %v993_v60 = vadd.f32 1.0, %v1505_v55  ;;  %v1402_v63 = vpop.f32.mrb[10].mxu0  ;;  %v1969_v11 = vadd.f32 %v1888_v41, %v847_v54  ;;  %v850_v12 = vmul.f32 %v1423_v44, %v1883_v39  ;;  %v942_v16 = vmul.f32 1.442695, %v903_v57 }
 0x104   : > { %v1509_v0 = vpop.eup %1508  ;;  %v1009_v1 = vadd.f32 1.0, %v1507_v59  ;;  %1524 = vpow2.f32 %v936_v56  ;;  %v1426_v5 = vpop.f32.mrb[10].mxu1  ;;  %v1973_v17 = vadd.f32 %v1888_v41, %v834_v58  ;;  %v1975_v20 = vmul.f32 1.442695, %v919_v61 }
 0x105   : > { %v610_v6 = vpop.f32.mrb[11].mxu0  ;;  %v1511_v9 = vpop.eup %1510  ;;  %1526 = vrcp.f32 %v993_v60  ;;  %v992_v10 = vadd.f32 1.0, %v1509_v0  ;;  %v902_v22 = vsub.f32 0.0, %v1964_v62  ;;  %v1983_v28 = vadd.f32 %v1888_v41, %v850_v12 }
 0x106   : > { %v690_v13 = vpop.f32.mrb[11].mxu1  ;;  %v1513_v14 = vpop.eup %1512  ;;  %1528 = vrcp.f32 %v1009_v1  ;;  %v1008_v15 = vadd.f32 1.0, %v1511_v9  ;;  %v833_v29 = vmul.f32 %v1883_v39, %v600_v48  ;;  %v918_v34 = vsub.f32 0.0, %v1969_v11 }
 0x107   : > { %v1515_v18 = vpop.eup %1514  ;;  %1530 = vrcp.f32 %v992_v10  ;;  %v995_v19 = vadd.f32 1.0, %v1513_v14  ;;  %v1978_v23 = vpop.f32.mrb[12].mxu0  ;;  %v849_v35 = vmul.f32 %v1883_v39, %v680_v53  ;;  %v905_v44 = vsub.f32 0.0, %v1973_v17 }
 0x108   : > { %v1980_v25 = vpop.f32.mrb[12].mxu1  ;;  %v1517_v26 = vpop.eup %1516  ;;  %1532 = vrcp.f32 %v1008_v15  ;;  %v1011_v27 = vadd.f32 1.0, %v1515_v18  ;;  %v836_v45 = vmul.f32 %v1402_v63, %v1883_v39  ;;  %v940_v48 = vmul.f32 1.442695, %v902_v22 }
 0x109   : > { %v1986_v30 = vpop.f32.mrb[13].mxu0  ;;  %v1988_v31 = vpop.f32.mrb[13].mxu1  ;;  %1534 = vrcp.f32 %v995_v19  ;;  %v994_v33 = vadd.f32 1.0, %v1517_v26  ;;  %v1996_v54 = vadd.f32 %v1888_v41, %v833_v29  ;;  %v921_v57 = vsub.f32 0.0, %v1983_v28 }
 0x10a   : > { %v1519_v32 = vpop.eup %1518  ;;  %1536 = vrcp.f32 %v1011_v27  ;;  %v2008_v58 = vadd.f32 %v1888_v41, %v849_v35  ;;  %v2015_v61 = vadd.f32 %v1888_v41, %v836_v45  ;;  %v852_v63 = vmul.f32 %v1426_v5, %v1883_v39 }
 0x10b   : > { %v1521_v38 = vpop.eup %1520  ;;  %v1010_v43 = vadd.f32 1.0, %v1519_v32  ;;  %1538 = vrcp.f32 %v994_v33  ;;  %v1998_v55 = vpop.f32.mrb[14].mxu0  ;;  %v835_v0 = vmul.f32 %v1883_v39, %v610_v6  ;;  %v972_v9 = vmul.f32 1.442695, %v918_v34 }
 0x10c   : > { %v1523_v46 = vpop.eup %1522  ;;  %v997_v47 = vadd.f32 1.0, %v1521_v38  ;;  %v2000_v56 = vpop.f32.mrb[14].mxu1  ;;  %v946_v10 = vmul.f32 1.442695, %v905_v44  ;;  %v851_v12 = vmul.f32 %v1883_v39, %v690_v13  ;;  %v904_v18 = vsub.f32 0.0, %v1996_v54 }
 0x10d   : > { %1540 = vrcp.f32 %v1010_v43  ;;  %v1013_v53 = vadd.f32 1.0, %v1523_v46  ;;  %v2010_v59 = vpop.f32.mrb[15].mxu0  ;;  %v2012_v60 = vpop.f32.mrb[15].mxu1  ;;  %v2023_v19 = vadd.f32 %v1888_v41, %v852_v63  ;;  %v920_v6 = vsub.f32 0.0, %v2008_v58 }
 0x10e   : > { %1542 = vrcp.f32 %v997_v47  ;;  %v1525_v1 = vpop.eup %1524  ;;  %v2028_v26 = vadd.f32 %v1888_v41, %v835_v0  ;;  %v978_v29 = vmul.f32 1.442695, %v921_v57  ;;  %v944_v35 = vmul.f32 1.442695, %v904_v18 }
 0x10f   : > { %1544 = vrcp.f32 %v1013_v53  ;;  %v1527_v14 = vpop.eup %1526  ;;  %v996_v15 = vadd.f32 1.0, %v1525_v1 }
 0x110   : > { %1546 = vpow2.f32 %v1966_v2  ;;  %v1529_v22 = vpop.eup %1528  ;;  %v1089_v5 = vmul.f32 %v1527_v14, %v1895_v49  ;;  %v907_v2 = vsub.f32 0.0, %v2015_v61  ;;  %v906_v38 = vsub.f32 0.0, %v2028_v26 }
 0x111   : > { %1548 = vpow2.f32 %v942_v16  ;;  %v1531_v13 = vpop.eup %1530  ;;  %v1105_v27 = vmul.f32 %v1529_v22, %v1898_v50  ;;  %v923_v16 = vsub.f32 0.0, %v2023_v19  ;;  %v2040_v50 = vadd.f32 %v1888_v41, %v851_v12 }
 0x112   : > { %1550 = vrcp.f32 %v996_v15  ;;  %v1533_v32 = vpop.eup %1532  ;;  %1121 = vst [vmem:[%s2033_s8 + $0x8] sm:$0xff] %v1089_v5  ;;  %v1088_v49 = vmul.f32 %v1531_v13, %v1901_v51  ;;  %v950_v46 = vmul.f32 1.442695, %v907_v2  ;;  %v948_v63 = vmul.f32 1.442695, %v906_v38 }
 0x113   : > { %1552 = vpow2.f32 %v1975_v20  ;;  %v1535_v33 = vpop.eup %1534  ;;  %1137 = vst [vmem:[%s2033_s8 + $0x88] sm:$0xff] %v1105_v27  ;;  %v1104_v34 = vmul.f32 %v1533_v32, %v1904_v52  ;;  %v976_v20 = vmul.f32 1.442695, %v920_v6  ;;  %v922_v53 = vsub.f32 0.0, %v2040_v50 }
 0x114   : > { %1554 = vpow2.f32 %v940_v48  ;;  %v1537_v43 = vpop.eup %1536  ;;  %1120 = vst [vmem:[%s2033_s8] sm:$0xff] %v1088_v49  ;;  %v1091_v51 = vmul.f32 %v1535_v33, %v1915_v3  ;;  %v982_v48 = vmul.f32 1.442695, %v923_v16  ;;  %v837_v22 = vmul.f32 %v1883_v39, %v1986_v30 }
 0x115   : > { %1556 = vpow2.f32 %v972_v9  ;;  %v1539_v44 = vpop.eup %1538  ;;  %1136 = vst [vmem:[%s2033_s8 + $0x80] sm:$0xff] %v1104_v34  ;;  %v1107_v45 = vmul.f32 %v1537_v43, %v1918_v4  ;;  %v838_v4 = vmul.f32 %v1978_v23, %v1883_v39  ;;  %v854_v23 = vmul.f32 %v1980_v25, %v1883_v39 }
 0x116   : > { %1558 = vpow2.f32 %v946_v10  ;;  %1123 = vst [vmem:[%s2033_s8 + $0x18] sm:$0xff] %v1091_v51  ;;  %v1090_v52 = vmul.f32 %v1539_v44, %v1921_v7  ;;  %v853_v25 = vmul.f32 %v1883_v39, %v1988_v31  ;;  %v856_v49 = vmul.f32 %v2000_v56, %v1883_v39 }
 0x117   : > { %v1541_v47 = vpop.eup %1540  ;;  %1560 = vpow2.f32 %v978_v29  ;;  %1139 = vst [vmem:[%s2033_s8 + $0x98] sm:$0xff] %v1107_v45  ;;  %v2074_v29 = vadd.f32 %v1888_v41, %v854_v23  ;;  %v2082_v33 = vadd.f32 %v1888_v41, %v837_v22  ;;  %v839_v34 = vmul.f32 %v1883_v39, %v2010_v59 }
 0x118   : > { %v1543_v3 = vpop.eup %1542  ;;  %v1106_v57 = vmul.f32 %v1541_v47, %v1924_v8  ;;  %1562 = vpow2.f32 %v944_v35  ;;  %1122 = vst [vmem:[%s2033_s8 + $0x10] sm:$0xff] %v1090_v52  ;;  %v980_v8 = vmul.f32 1.442695, %v922_v53  ;;  %v2087_v38 = vadd.f32 %v1888_v41, %v853_v25 }
 0x119   : > { %v1545_v0 = vpop.eup %1544  ;;  %v1093_v1 = vmul.f32 %v1543_v3, %v1933_v21  ;;  %1564 = vpow2.f32 %v976_v20  ;;  %v2065_v21 = vadd.f32 %v1888_v41, %v838_v4  ;;  %v855_v43 = vmul.f32 %v1883_v39, %v2012_v60 }
 0x11a   : > { %v1547_v7 = vpop.eup %1546  ;;  %1138 = vst [vmem:[%s2033_s8 + $0x90] sm:$0xff] %v1106_v57  ;;  %v1109_v9 = vmul.f32 %v1545_v0, %v1936_v24  ;;  %1566 = vpow2.f32 %v950_v46  ;;  %v925_v20 = vsub.f32 0.0, %v2074_v29  ;;  %v2096_v47 = vadd.f32 %v1888_v41, %v856_v49 }
 0x11b   : > { %v1549_v10 = vpop.eup %1548  ;;  %1125 = vst [vmem:[%s2033_s8 + $0x28] sm:$0xff] %v1093_v1  ;;  %v1012_v12 = vadd.f32 1.0, %v1547_v7  ;;  %1568 = vpow2.f32 %v982_v48  ;;  %v909_v30 = vsub.f32 0.0, %v2065_v21  ;;  %v2100_v60 = vadd.f32 %v1888_v41, %v839_v34 }
 0x11c   : > { %v1551_v14 = vpop.eup %1550  ;;  %1141 = vst [vmem:[%s2033_s8 + $0xa8] sm:$0xff] %v1109_v9  ;;  %v999_v15 = vadd.f32 1.0, %v1549_v10  ;;  %1570 = vpow2.f32 %v948_v63  ;;  %v924_v57 = vsub.f32 0.0, %v2087_v38  ;;  %v2104_v63 = vadd.f32 %v1888_v41, %v855_v43 }
 0x11d   : > { %v1553_v18 = vpop.eup %1552  ;;  %v1092_v24 = vmul.f32 %v1551_v14, %v1945_v36  ;;  %1572 = vrcp.f32 %v1012_v12  ;;  %v840_v36 = vmul.f32 %v1998_v55, %v1883_v39  ;;  %v954_v46 = vmul.f32 1.442695, %v909_v30 }
 0x11e   : > { %v1555_v5 = vpop.eup %1554  ;;  %1574 = vrcp.f32 %v999_v15  ;;  %v1015_v6 = vadd.f32 1.0, %v1553_v18  ;;  %v908_v39 = vsub.f32 0.0, %v2082_v33  ;;  %v986_v1 = vmul.f32 1.442695, %v925_v20 }
 0x11f   : > { %v1557_v13 = vpop.eup %1556  ;;  %1124 = vst [vmem:[%s2033_s8 + $0x20] sm:$0xff] %v1092_v24  ;;  %v998_v27 = vadd.f32 1.0, %v1555_v5  ;;  %1576 = vpow2.f32 %v980_v8  ;;  %v2093_v44 = vadd.f32 %v1888_v41, %v840_v36  ;;  %v927_v12 = vsub.f32 0.0, %v2096_v47 }
 0x120   : > { %v1559_v2 = vpop.eup %1558  ;;  %1578 = vrcp.f32 %v1015_v6  ;;  %v1014_v32 = vadd.f32 1.0, %v1557_v13  ;;  %v952_v41 = vmul.f32 1.442695, %v908_v39  ;;  %v910_v14 = vsub.f32 0.0, %v2100_v60 }
 0x121   : > { %v1561_v16 = vpop.eup %1560  ;;  %1580 = vrcp.f32 %v998_v27  ;;  %v1001_v31 = vadd.f32 1.0, %v1559_v2  ;;  %v911_v7 = vsub.f32 0.0, %v2093_v44  ;;  %v984_v24 = vmul.f32 1.442695, %v924_v57 }
 0x122   : > { %v1563_v35 = vpop.eup %1562  ;;  %1582 = vrcp.f32 %v1014_v32  ;;  %v1017_v55 = vadd.f32 1.0, %v1561_v16  ;;  %v926_v22 = vsub.f32 0.0, %v2104_v63  ;;  %v990_v13 = vmul.f32 1.442695, %v927_v12 }
 0x123   : > { %v1565_v51 = vpop.eup %1564  ;;  %1584 = vrcp.f32 %v1001_v31  ;;  %v1000_v56 = vadd.f32 1.0, %v1563_v35  ;;  %v958_v6 = vmul.f32 1.442695, %v911_v7  ;;  %v956_v2 = vmul.f32 1.442695, %v910_v14 }
 0x124   : > { %v1567_v45 = vpop.eup %1566  ;;  %1586 = vrcp.f32 %v1017_v55  ;;  %v1016_v59 = vadd.f32 1.0, %v1565_v51  ;;  %v988_v30 = vmul.f32 1.442695, %v926_v22 }
 0x125   : > { %v1569_v52 = vpop.eup %1568  ;;  %1588 = vrcp.f32 %v1000_v56  ;;  %v1003_v48 = vadd.f32 1.0, %v1567_v45 }
 0x126   : > { %v1571_v53 = vpop.eup %1570  ;;  %1590 = vrcp.f32 %v1016_v59  ;;  %v1019_v3 = vadd.f32 1.0, %v1569_v52 }
 0x127   : > { %v1573_v4 = vpop.eup %1572  ;;  %1592 = vrcp.f32 %v1003_v48  ;;  %v1002_v0 = vadd.f32 1.0, %v1571_v53 }
 0x128   : > { %v1575_v9 = vpop.eup %1574  ;;  %v1108_v10 = vmul.f32 %v1573_v4, %v1948_v37  ;;  %1594 = vrcp.f32 %v1019_v3 }
 0x129   : > { %v1577_v8 = vpop.eup %1576  ;;  %v1095_v23 = vmul.f32 %v1575_v9, %v1951_v40  ;;  %1596 = vrcp.f32 %v1002_v0 }
 0x12a   : > { %v1579_v15 = vpop.eup %1578  ;;  %1140 = vst [vmem:[%s2033_s8 + $0xa0] sm:$0xff] %v1108_v10  ;;  %v1018_v18 = vadd.f32 1.0, %v1577_v8  ;;  %1598 = vpow2.f32 %v954_v46 }
 0x12b   : > { %v1581_v37 = vpop.eup %1580  ;;  %1127 = vst [vmem:[%s2033_s8 + $0x38] sm:$0xff] %v1095_v23  ;;  %v1111_v5 = vmul.f32 %v1579_v15, %v1954_v42  ;;  %1600 = vpow2.f32 %v986_v1 }
 0x12c   : > { %v1583_v40 = vpop.eup %1582  ;;  %v1094_v25 = vmul.f32 %v1581_v37, %v1964_v62  ;;  %1602 = vrcp.f32 %v1018_v18 }
 0x12d   : > { %v1585_v27 = vpop.eup %1584  ;;  %1143 = vst [vmem:[%s2033_s8 + $0xb8] sm:$0xff] %v1111_v5  ;;  %v1110_v36 = vmul.f32 %v1583_v40, %v1969_v11  ;;  %1604 = vpow2.f32 %v952_v41 }
 0x12e   : > { %v1587_v32 = vpop.eup %1586  ;;  %1126 = vst [vmem:[%s2033_s8 + $0x30] sm:$0xff] %v1094_v25  ;;  %v1097_v42 = vmul.f32 %v1585_v27, %v1973_v17  ;;  %1606 = vpow2.f32 %v984_v24 }
 0x12f   : > { %v1589_v49 = vpop.eup %1588  ;;  %1142 = vst [vmem:[%s2033_s8 + $0xb0] sm:$0xff] %v1110_v36  ;;  %v1113_v62 = vmul.f32 %v1587_v32, %v1983_v28  ;;  %1608 = vpow2.f32 %v958_v6 }
 0x130   : > { %v1591_v16 = vpop.eup %1590  ;;  %1129 = vst [vmem:[%s2033_s8 + $0x48] sm:$0xff] %v1097_v42  ;;  %v1096_v11 = vmul.f32 %v1589_v49, %v1996_v54  ;;  %1610 = vpow2.f32 %v990_v13 }
 0x131   : > { %v1593_v31 = vpop.eup %1592  ;;  %1145 = vst [vmem:[%s2033_s8 + $0xc8] sm:$0xff] %v1113_v62  ;;  %v1112_v17 = vmul.f32 %v1591_v16, %v2008_v58  ;;  %1612 = vpow2.f32 %v956_v2 }
 0x132   : > { %v1595_v34 = vpop.eup %1594  ;;  %1128 = vst [vmem:[%s2033_s8 + $0x40] sm:$0xff] %v1096_v11  ;;  %v1099_v35 = vmul.f32 %v1593_v31, %v2015_v61  ;;  %1614 = vpow2.f32 %v988_v30 }
 0x133   : > { %v1597_v28 = vpop.eup %1596  ;;  %1144 = vst [vmem:[%s2033_s8 + $0xc0] sm:$0xff] %v1112_v17  ;;  %v1115_v55 = vmul.f32 %v1595_v34, %v2023_v19 }
 0x134   : > { %v1599_v43 = vpop.eup %1598  ;;  %1131 = vst [vmem:[%s2033_s8 + $0x58] sm:$0xff] %v1099_v35  ;;  %v1098_v54 = vmul.f32 %v1597_v28, %v2028_v26 }
 0x135   : > { %v1601_v51 = vpop.eup %1600  ;;  %1147 = vst [vmem:[%s2033_s8 + $0xd8] sm:$0xff] %v1115_v55  ;;  %v1005_v56 = vadd.f32 1.0, %v1599_v43 }
 0x136   : > { %v1603_v58 = vpop.eup %1602  ;;  %1130 = vst [vmem:[%s2033_s8 + $0x50] sm:$0xff] %v1098_v54  ;;  %v1021_v20 = vadd.f32 1.0, %v1601_v51 }
 0x137   : > { %v1605_v45 = vpop.eup %1604  ;;  %v1114_v59 = vmul.f32 %v1603_v58, %v2040_v50  ;;  %1616 = vrcp.f32 %v1005_v56 }
 0x138   : > { %v1607_v61 = vpop.eup %1606  ;;  %1618 = vrcp.f32 %v1021_v20  ;;  %v1004_v46 = vadd.f32 1.0, %v1605_v45 }
 0x139   : > { %v1609_v52 = vpop.eup %1608  ;;  %1146 = vst [vmem:[%s2033_s8 + $0xd0] sm:$0xff] %v1114_v59  ;;  %v1020_v19 = vadd.f32 1.0, %v1607_v61 }
 0x13a   : > { %v1611_v48 = vpop.eup %1610  ;;  %1620 = vrcp.f32 %v1004_v46  ;;  %v1007_v39 = vadd.f32 1.0, %v1609_v52 }
 0x13b   : > { %v1613_v26 = vpop.eup %1612  ;;  %1622 = vrcp.f32 %v1020_v19  ;;  %v1023_v53 = vadd.f32 1.0, %v1611_v48 }
 0x13c   : > { %v1615_v3 = vpop.eup %1614  ;;  %1624 = vrcp.f32 %v1007_v39  ;;  %v1006_v57 = vadd.f32 1.0, %v1613_v26 }
 0x13d   : > { %1626 = vrcp.f32 %v1023_v53  ;;  %v1022_v50 = vadd.f32 1.0, %v1615_v3 }
 0x13e   : > { %1628 = vrcp.f32 %v1006_v57 }
 0x13f   : > { %1630 = vrcp.f32 %v1022_v50 }
 0x141   : > { %v1617_v4 = vpop.eup %1616 }
 0x142   : > { %v1619_v0 = vpop.eup %1618  ;;  %v1101_v1 = vmul.f32 %v1617_v4, %v2065_v21 }
 0x143   : > { %v1117_v7 = vmul.f32 %v1619_v0, %v2074_v29 }
 0x144   : > { %v1621_v9 = vpop.eup %1620  ;;  %1133 = vst [vmem:[%s2033_s8 + $0x68] sm:$0xff] %v1101_v1 }
 0x145   : > { %v1623_v10 = vpop.eup %1622  ;;  %1149 = vst [vmem:[%s2033_s8 + $0xe8] sm:$0xff] %v1117_v7  ;;  %v1100_v12 = vmul.f32 %v1621_v9, %v2082_v33 }
 0x146   : > { %v1625_v8 = vpop.eup %1624  ;;  %v1116_v23 = vmul.f32 %v1623_v10, %v2087_v38 }
 0x147   : > { %v1627_v41 = vpop.eup %1626  ;;  %1132 = vst [vmem:[%s2033_s8 + $0x60] sm:$0xff] %v1100_v12  ;;  %v1103_v21 = vmul.f32 %v1625_v8, %v2093_v44 }
 0x148   : > { %v1629_v29 = vpop.eup %1628  ;;  %1148 = vst [vmem:[%s2033_s8 + $0xe0] sm:$0xff] %v1116_v23  ;;  %v1119_v14 = vmul.f32 %v1627_v41, %v2096_v47 }
 0x149   : > { %v1631_v15 = vpop.eup %1630  ;;  %1135 = vst [vmem:[%s2033_s8 + $0x78] sm:$0xff] %v1103_v21  ;;  %v1102_v33 = vmul.f32 %v1629_v29, %v2100_v60 }
 0x14a   : > { %1151 = vst [vmem:[%s2033_s8 + $0xf8] sm:$0xff] %v1119_v14  ;;  %v1118_v38 = vmul.f32 %v1631_v15, %v2104_v63 }
 0x14b   : > { %1134 = vst [vmem:[%s2033_s8 + $0x70] sm:$0xff] %v1102_v33 }
 0x14c   : > { %1150 = vst [vmem:[%s2033_s8 + $0xf0] sm:$0xff] %v1118_v38 }
 0x14d   : > { %1645 = shalt.err (!%p1642_p5)
}
 0x14e   : > { %s1646_s26 = scalar_lea.hbm %s2153_s18, 4096  ;;  %s1650_s5 = scalar_lea.hbm %s2213_s4, 8192 }
 0x14f   : > { %p1647_p6 = scmp.ne.s32.totalorder %s2153_s18, %s1646_s26  ;;  %p1651_p10 = scmp.lt.u32.totalorder %s2153_s18, %s2213_s4 }
 0x150   : > { %p1652_p11 = scmp.lt.u32.totalorder %s1650_s5, %s1646_s26  ;;  %p1654_p13 = scmp.lt.u32.totalorder %s1646_s26, %s2153_s18 }
 0x151   : > { %p1648_p7 = pnand %p1647_p6, %p1780_p4 }
 0x152   : > { %p1653_p12 = por %p1652_p11, %p1651_p10 }
 0x153   : > { %p1649_p9 = pneg %p1648_p7 }
 0x154   : > { %p1655_p0 = por %p1654_p13, %p1653_p12 }
 0x156   : > { %p1656_p1 = pnand %p1655_p0, %p1649_p9 }
 0x158   : > { %1659 = shalt.err (!%p1656_p1)
}
 0x159   : > { %s1713_s8 = smov 128   ;;  %s1714_s9 = smov 8  }
 0x15a   : > { %1447 = dma.vmem_to_hbm [thread:$0]  (%p1780_p4), %s2155_s10, 4096, %s2153_s18, %s2163_s13, %s1713_s8, %s1713_s8, %s1714_s9  }
 0x15b PF: > { %p1453_p2 = scmp.ge.s32.totalorder %s1710_s20, 2  ;;  %s1182_s11 = sand.u32 1, %s1690_s15  }
 0x15c   : > { %s1183_s12 = scalar_lea.sflag [#allocation4], %s1182_s11 }
 0x15d   : > { %p1450_p3 = pnand %p1453_p2, %p1787_p8 }
 0x15f   : > { %1685 = dma.done.wait (!%p1450_p3), %s1183_s12, 4096  }
 0x160   : > { %1687 = vsyncadd (!%p1450_p3), %s1183_s12, 4294963200  ;;  %s17_s20 = sadd.s32 1, %s1710_s20   ;;  %s2216_s15 = smov %s1694_s16 }
 0x161   : > { %p14_p5 = scmp.ge.s32.totalorder %s17_s20, 4   ;;  %s2217_s16 = smov %s1698_s17 }
 0x162   : > { %s2218_s17 = smov %s1793_s28  ;;  %s2219_s18 = smov %s1706_s19 }
 0x163   : > { %s2220_s19 = smov %s2222_s23  ;;  %16 = sbr.rel (!%p14_p5) target bundleno = 4 (0x4), region = 88 }
 0x16a   :  { %1188 = vsyncpa [#allocation4], 1 }
 0x16b   :  { %1190 = vsyncpa [#allocation4 + $0x1], 1 }

</bundles_post_ra>
